<compile_context>
chip_gen: v7x
topology: tpu7x:2x2x1
jax: 0.10.0
libtpu: 0.0.40
codegen_flags: <defaults>
</compile_context>

<pallas_src>
import jax
import jax.numpy as jnp
from jax.experimental import pallas as pl
from jax.experimental.pallas import tpu as pltpu


def _round_up(x: int, m: int) -> int:
    return (x + m - 1) // m * m


def _sigmoid(x):
    # One EUP tanh instead of exp + divide.
    return 0.5 * (jnp.tanh(0.5 * x) + 1.0)


def _stacked_lstm_kernel(x_ref, h0_ref, c0_ref, w_ref, b_ref,
                         h1_ref, c1_ref, xh_ref):
    """One grid step == one LSTMCell layer (PyTorch gate order i, f, g, o).

    x_ref  : [B_p, In_p]              padded layer-0 input (same block every step)
    h0_ref : [1, B_p, H_p]            c0_ref: [1, B_p, H_p]
    w_ref  : [1, In_p + H_p, 4*H_p]   fused [W_ih^T ; W_hh^T], zero-padded
    b_ref  : [1, 1, 4*H_p]            b_ih + b_hh, zero-padded
    h1_ref / c1_ref : [1, B_p, H_p]
    xh_ref : VMEM scratch [B_p, In_p + H_p] — concatenated [input ; h0] operand;
             its input region also carries the activation to the next layer.
    """
    l = pl.program_id(0)
    num_l = pl.num_programs(0)
    in_p = x_ref.shape[1]
    h_p = h0_ref.shape[-1]

    @pl.when(l == 0)
    def _():
        xh_ref[:, :in_p] = x_ref[...]

    # Current layer's recurrent state goes into the tail of the fused operand.
    xh_ref[:, in_p:] = h0_ref[0]

    w = w_ref[0].astype(jnp.float32)           # no-op for f32; upcast if bf16
    gates = jnp.dot(xh_ref[...], w, preferred_element_type=jnp.float32)
    gates = gates + b_ref[0]

    i_g = _sigmoid(gates[:, 0 * h_p:1 * h_p])
    f_g = _sigmoid(gates[:, 1 * h_p:2 * h_p])
    g_g = jnp.tanh(gates[:, 2 * h_p:3 * h_p])
    o_g = _sigmoid(gates[:, 3 * h_p:4 * h_p])

    c1 = f_g * c0_ref[0] + i_g * g_g
    h1 = o_g * jnp.tanh(c1)

    c1_ref[0] = c1
    h1_ref[0] = h1

    @pl.when(l + 1 < num_l)
    def _():
        # Carry this layer's h to the next layer's input region.
        # (Dropout between layers is identity at inference.)
        xh_ref[:, :h_p] = h1
        if in_p > h_p:  # static: clear stale layer-0 columns (zero weight rows anyway)
            xh_ref[:, h_p:in_p] = jnp.zeros(
                (xh_ref.shape[0], in_p - h_p), xh_ref.dtype)


class StackedLSTMParams:
    """Parameters mirroring nn.ModuleList([nn.LSTMCell, ...]) + packed fused layout."""

    def __init__(self, key, num_layers, input_size, rnn_size, dropout=0.0,
                 dtype=jnp.float32):
        self.num_layers = num_layers
        self.input_size = input_size
        self.rnn_size = rnn_size
        self.dropout = dropout  # unused at inference (eval semantics)

        H = rnn_size
        bound = 1.0 / float(H) ** 0.5
        self.layers = []
        in_sz = input_size
        for _ in range(num_layers):
            key, k1, k2, k3, k4 = jax.random.split(key, 5)
            # PyTorch LSTMCell: weight_ih [4H, in], weight_hh [4H, H], biases [4H].
            self.layers.append(dict(
                w_ih=jax.random.uniform(k1, (4 * H, in_sz), dtype, -bound, bound),
                w_hh=jax.random.uniform(k2, (4 * H, H), dtype, -bound, bound),
                b_ih=jax.random.uniform(k3, (4 * H,), dtype, -bound, bound),
                b_hh=jax.random.uniform(k4, (4 * H,), dtype, -bound, bound),
            ))
            in_sz = H

        # ---- packed, lane-dense, fused layout ----
        self.h_pad = _round_up(H, 128)
        self.in_pad = max(_round_up(input_size, 128), self.h_pad)
        self.k_rows = self.in_pad + self.h_pad

        H_p, In_p = self.h_pad, self.in_pad
        w_packed = jnp.zeros((num_layers, self.k_rows, 4 * H_p), jnp.float32)
        b_packed = jnp.zeros((num_layers, 1, 4 * H_p), jnp.float32)
        for l, lyr in enumerate(self.layers):
            in_l = input_size if l == 0 else H
            w_ih_t = jnp.transpose(lyr["w_ih"]).astype(jnp.float32)  # [in_l, 4H]
            w_hh_t = jnp.transpose(lyr["w_hh"]).astype(jnp.float32)  # [H, 4H]
            b_fused = (lyr["b_ih"] + lyr["b_hh"]).astype(jnp.float32)
            for g in range(4):
                w_packed = w_packed.at[l, :in_l, g * H_p:g * H_p + H].set(
                    w_ih_t[:, g * H:(g + 1) * H])
                w_packed = w_packed.at[l, In_p:In_p + H, g * H_p:g * H_p + H].set(
                    w_hh_t[:, g * H:(g + 1) * H])
                b_packed = b_packed.at[l, 0, g * H_p:g * H_p + H].set(
                    b_fused[g * H:(g + 1) * H])
        self.w_packed = w_packed
        self.b_packed = b_packed


def stacked_lstm_forward(params, x, hidden, *, weight_dtype=None):
    """Matches StackedLSTM.forward (eval mode).

    x:      [B, input_size] or [B, 1, input_size]
    hidden: (h_0, c_0), each [num_layers, B, rnn_size]
    weight_dtype: optional storage dtype for the fused weights (e.g. bf16).
    returns (out, (h_1, c_1))
    """
    h_0, c_0 = hidden
    triplet_dim = False
    if x.ndim == 3:
        assert x.shape[1] == 1
        triplet_dim = True
        x = jnp.squeeze(x, axis=1)

    B = x.shape[0]
    L, H = params.num_layers, params.rnn_size
    H_p, In_p, K = params.h_pad, params.in_pad, params.k_rows
    B_p = _round_up(B, 8)

    x_p = jnp.pad(x.astype(jnp.float32),
                  ((0, B_p - B), (0, In_p - x.shape[1])))
    h0_p = jnp.pad(h_0.astype(jnp.float32),
                   ((0, 0), (0, B_p - B), (0, H_p - H)))
    c0_p = jnp.pad(c_0.astype(jnp.float32),
                   ((0, 0), (0, B_p - B), (0, H_p - H)))

    w = params.w_packed if weight_dtype is None else params.w_packed.astype(weight_dtype)
    b = params.b_packed

    h1_p, c1_p = pl.pallas_call(
        _stacked_lstm_kernel,
        out_shape=(jax.ShapeDtypeStruct((L, B_p, H_p), jnp.float32),
                   jax.ShapeDtypeStruct((L, B_p, H_p), jnp.float32)),
        grid_spec=pltpu.PrefetchScalarGridSpec(
            num_scalar_prefetch=0,
            grid=(L,),
            in_specs=[
                pl.BlockSpec((B_p, In_p), lambda l: (0, 0)),
                pl.BlockSpec((1, B_p, H_p), lambda l: (l, 0, 0)),
                pl.BlockSpec((1, B_p, H_p), lambda l: (l, 0, 0)),
                pl.BlockSpec((1, K, 4 * H_p), lambda l: (l, 0, 0)),
                pl.BlockSpec((1, 1, 4 * H_p), lambda l: (l, 0, 0)),
            ],
            out_specs=(
                pl.BlockSpec((1, B_p, H_p), lambda l: (l, 0, 0)),
                pl.BlockSpec((1, B_p, H_p), lambda l: (l, 0, 0)),
            ),
            scratch_shapes=[pltpu.VMEM((B_p, K), jnp.float32)],
        ),
        compiler_params=pltpu.CompilerParams(
            dimension_semantics=("arbitrary",)),  # layers are sequential (carry)
    )(x_p, h0_p, c0_p, w, b)

    h_1 = h1_p[:, :B, :H]
    c_1 = c1_p[:, :B, :H]
    out = h_1[-1]
    if triplet_dim:
        out = out[:, None, :]
    return out, (h_1, c_1)


def _reference_forward(params, x, hidden, weight_dtype=jnp.float32):
    """Pure-JAX reference (PyTorch LSTMCell math) for correctness checking."""
    h_0, c_0 = hidden
    if x.ndim == 3:
        x = jnp.squeeze(x, axis=1)
    inp = x.astype(jnp.float32)
    H = params.rnn_size
    hs, cs = [], []
    for i, lyr in enumerate(params.layers):
        w_ih = lyr["w_ih"].astype(weight_dtype).astype(jnp.float32)
        w_hh = lyr["w_hh"].astype(weight_dtype).astype(jnp.float32)
        gates = (inp @ w_ih.T + h_0[i].astype(jnp.float32) @ w_hh.T
                 + lyr["b_ih"].astype(jnp.float32) + lyr["b_hh"].astype(jnp.float32))
        i_g = jax.nn.sigmoid(gates[:, :H])
        f_g = jax.nn.sigmoid(gates[:, H:2 * H])
        g_g = jnp.tanh(gates[:, 2 * H:3 * H])
        o_g = jax.nn.sigmoid(gates[:, 3 * H:])
        c1 = f_g * c_0[i].astype(jnp.float32) + i_g * g_g
        h1 = o_g * jnp.tanh(c1)
        inp = h1
        hs.append(h1)
        cs.append(c1)
    return inp, (jnp.stack(hs), jnp.stack(cs))


if __name__ == "__main__":
    num_layers = 2
    input_size = 160   # layer-0 input width != rnn_size (input-feeding decoder)
    rnn_size = 96      # not a multiple of 128 -> exercises lane padding
    batch = 5          # not a multiple of 8  -> exercises sublane padding

    key = jax.random.PRNGKey(0)
    key, kp, kx, kh, kc = jax.random.split(key, 5)
    params = StackedLSTMParams(kp, num_layers, input_size, rnn_size, dropout=0.3)

    x = jax.random.normal(kx, (batch, 1, input_size), jnp.float32)   # triplet input
    h_0 = jax.random.normal(kh, (num_layers, batch, rnn_size), jnp.float32)
    c_0 = jax.random.normal(kc, (num_layers, batch, rnn_size), jnp.float32)

    # f32 weights
    out, (h_1, c_1) = stacked_lstm_forward(params, x, (h_0, c_0))
    jax.block_until_ready(out)
    jax.block_until_ready(h_1)
    jax.block_until_ready(c_1)

    ref_out, (ref_h, ref_c) = _reference_forward(params, x, (h_0, c_0))
    assert out.shape == (batch, 1, rnn_size)
    assert h_1.shape == (num_layers, batch, rnn_size)
    assert c_1.shape == (num_layers, batch, rnn_size)
    assert jnp.allclose(jnp.squeeze(out, 1), ref_out, atol=1e-4, rtol=1e-4)
    assert jnp.allclose(h_1, ref_h, atol=1e-4, rtol=1e-4)
    assert jnp.allclose(c_1, ref_c, atol=1e-4, rtol=1e-4)

    # bf16 weight storage (halves weight DMA bytes); compute/state stay f32.
    out_b, (h_b, c_b) = stacked_lstm_forward(params, x, (h_0, c_0),
                                             weight_dtype=jnp.bfloat16)
    jax.block_until_ready(out_b)
    ref_out_b, (ref_hb, ref_cb) = _reference_forward(params, x, (h_0, c_0),
                                                     weight_dtype=jnp.bfloat16)
    assert jnp.allclose(jnp.squeeze(out_b, 1), ref_out_b, atol=1e-3, rtol=1e-3)
    assert jnp.allclose(h_b, ref_hb, atol=1e-3, rtol=1e-3)
    assert jnp.allclose(c_b, ref_cb, atol=1e-3, rtol=1e-3)

    print("KERNEL_OK")
</pallas_src>

<mosaic_0001>
module attributes {stable_mosaic.version = 11 : i64} {
  func.func @_stacked_lstm_kernel(%arg0: i32, %arg1: memref<8x256xf32, #tpu.memory_space<vmem>>, %arg2: memref<1x8x128xf32, #tpu.memory_space<vmem>>, %arg3: memref<1x8x128xf32, #tpu.memory_space<vmem>>, %arg4: memref<1x384x512xf32, #tpu.memory_space<vmem>>, %arg5: memref<1x1x512xf32, #tpu.memory_space<vmem>>, %arg6: memref<1x8x128xf32, #tpu.memory_space<vmem>>, %arg7: memref<1x8x128xf32, #tpu.memory_space<vmem>>, %arg8: memref<8x384xf32, #tpu.memory_space<vmem>>) attributes {dimension_semantics = [#tpu.dimension_semantics<arbitrary>], iteration_bounds = array<i64: 2>, scalar_prefetch = 0 : i64, scratch_operands = 1 : i64, tpu.core_type = #tpu.core_type<tc>, window_params = [{pipeline_mode = #tpu.pipeline_mode<synchronous>, transform_indices = @transform_0, window_bounds = array<i64: 8, 256>}, {transform_indices = @transform_1, window_bounds = array<i64: 1, 8, 128>}, {transform_indices = @transform_2, window_bounds = array<i64: 1, 8, 128>}, {transform_indices = @transform_3, window_bounds = array<i64: 1, 384, 512>}, {transform_indices = @transform_4, window_bounds = array<i64: 1, 1, 512>}, {transform_indices = @transform_5, window_bounds = array<i64: 1, 8, 128>}, {transform_indices = @transform_6, window_bounds = array<i64: 1, 8, 128>}]} {
    %c0_i32 = arith.constant 0 : i32
    %0 = arith.cmpi eq, %arg0, %c0_i32 : i32
    %1 = arith.extui %0 : i1 to i32
    %c0_i32_0 = arith.constant 0 : i32
    %2 = arith.cmpi ne, %1, %c0_i32_0 : i32
    scf.if %2 {
      %c0_31 = arith.constant 0 : index
      %c0_32 = arith.constant 0 : index
      %57 = vector.load %arg1[%c0_31, %c0_32] : memref<8x256xf32, #tpu.memory_space<vmem>>, vector<8x256xf32>
      %c0_33 = arith.constant 0 : index
      %c0_34 = arith.constant 0 : index
      %58 = vector.load %arg8[%c0_33, %c0_34] : memref<8x384xf32, #tpu.memory_space<vmem>>, vector<8x256xf32>
      tpu.vector_store %arg8[%c0_33, %c0_34], %57 {strides = array<i32>} : memref<8x384xf32, #tpu.memory_space<vmem>>, vector<8x256xf32>,
    } else {
    }
    %c0 = arith.constant 0 : index
    %c0_1 = arith.constant 0 : index
    %c0_2 = arith.constant 0 : index
    %3 = vector.load %arg2[%c0, %c0_1, %c0_2] : memref<1x8x128xf32, #tpu.memory_space<vmem>>, vector<1x8x128xf32>
    %4 = vector.shape_cast %3 : vector<1x8x128xf32> to vector<8x128xf32>
    %c0_3 = arith.constant 0 : index
    %c256 = arith.constant 256 : index
    %5 = vector.load %arg8[%c0_3, %c256] : memref<8x384xf32, #tpu.memory_space<vmem>>, vector<8x128xf32>
    tpu.vector_store %arg8[%c0_3, %c256], %4 {strides = array<i32>} : memref<8x384xf32, #tpu.memory_space<vmem>>, vector<8x128xf32>,
    %c0_4 = arith.constant 0 : index
    %c0_5 = arith.constant 0 : index
    %c0_6 = arith.constant 0 : index
    %6 = vector.load %arg4[%c0_4, %c0_5, %c0_6] : memref<1x384x512xf32, #tpu.memory_space<vmem>>, vector<1x384x512xf32>
    %7 = vector.shape_cast %6 : vector<1x384x512xf32> to vector<384x512xf32>
    %c0_7 = arith.constant 0 : index
    %c0_8 = arith.constant 0 : index
    %8 = vector.load %arg8[%c0_7, %c0_8] : memref<8x384xf32, #tpu.memory_space<vmem>>, vector<8x384xf32>
    %cst = arith.constant dense<0.000000e+00> : vector<8x512xf32>
    %9 = tpu.matmul %8, %7, %cst {dimension_numbers = #tpu.dot_dimension_numbers<[1], [0], [0], [1], [0, 0, 1, 1], [], []>} : vector<8x384xf32>, vector<384x512xf32>, vector<8x512xf32> -> vector<8x512xf32>
    %c0_9 = arith.constant 0 : index
    %c0_10 = arith.constant 0 : index
    %c0_11 = arith.constant 0 : index
    %10 = vector.load %arg5[%c0_9, %c0_10, %c0_11] : memref<1x1x512xf32, #tpu.memory_space<vmem>>, vector<1x1x512xf32>
    %11 = vector.shape_cast %10 : vector<1x1x512xf32> to vector<1x512xf32>
    %12 = vector.broadcast %11 : vector<1x512xf32> to vector<8x512xf32>
    %13 = arith.addf %9, %12 : vector<8x512xf32>
    %14 = vector.extract_strided_slice %13 {offsets = [0, 0], sizes = [8, 128], strides = [1, 1]} : vector<8x512xf32> to vector<8x128xf32>
    %cst_12 = arith.constant 5.000000e-01 : f32
    %15 = vector.broadcast %cst_12 : f32 to vector<8x128xf32>
    %16 = arith.mulf %15, %14 : vector<8x128xf32>
    %17 = math.tanh %16 : vector<8x128xf32>
    %cst_13 = arith.constant 1.000000e+00 : f32
    %18 = vector.broadcast %cst_13 : f32 to vector<8x128xf32>
    %19 = arith.addf %17, %18 : vector<8x128xf32>
    %cst_14 = arith.constant 5.000000e-01 : f32
    %20 = vector.broadcast %cst_14 : f32 to vector<8x128xf32>
    %21 = arith.mulf %20, %19 : vector<8x128xf32>
    %22 = vector.extract_strided_slice %13 {offsets = [0, 128], sizes = [8, 128], strides = [1, 1]} : vector<8x512xf32> to vector<8x128xf32>
    %cst_15 = arith.constant 5.000000e-01 : f32
    %23 = vector.broadcast %cst_15 : f32 to vector<8x128xf32>
    %24 = arith.mulf %23, %22 : vector<8x128xf32>
    %25 = math.tanh %24 : vector<8x128xf32>
    %cst_16 = arith.constant 1.000000e+00 : f32
    %26 = vector.broadcast %cst_16 : f32 to vector<8x128xf32>
    %27 = arith.addf %25, %26 : vector<8x128xf32>
    %cst_17 = arith.constant 5.000000e-01 : f32
    %28 = vector.broadcast %cst_17 : f32 to vector<8x128xf32>
    %29 = arith.mulf %28, %27 : vector<8x128xf32>
    %30 = vector.extract_strided_slice %13 {offsets = [0, 256], sizes = [8, 128], strides = [1, 1]} : vector<8x512xf32> to vector<8x128xf32>
    %31 = math.tanh %30 : vector<8x128xf32>
    %32 = vector.extract_strided_slice %13 {offsets = [0, 384], sizes = [8, 128], strides = [1, 1]} : vector<8x512xf32> to vector<8x128xf32>
    %cst_18 = arith.constant 5.000000e-01 : f32
    %33 = vector.broadcast %cst_18 : f32 to vector<8x128xf32>
    %34 = arith.mulf %33, %32 : vector<8x128xf32>
    %35 = math.tanh %34 : vector<8x128xf32>
    %cst_19 = arith.constant 1.000000e+00 : f32
    %36 = vector.broadcast %cst_19 : f32 to vector<8x128xf32>
    %37 = arith.addf %35, %36 : vector<8x128xf32>
    %cst_20 = arith.constant 5.000000e-01 : f32
    %38 = vector.broadcast %cst_20 : f32 to vector<8x128xf32>
    %39 = arith.mulf %38, %37 : vector<8x128xf32>
    %c0_21 = arith.constant 0 : index
    %c0_22 = arith.constant 0 : index
    %c0_23 = arith.constant 0 : index
    %40 = vector.load %arg3[%c0_21, %c0_22, %c0_23] : memref<1x8x128xf32, #tpu.memory_space<vmem>>, vector<1x8x128xf32>
    %41 = vector.shape_cast %40 : vector<1x8x128xf32> to vector<8x128xf32>
    %42 = arith.mulf %29, %41 : vector<8x128xf32>
    %43 = arith.mulf %21, %31 : vector<8x128xf32>
    %44 = arith.addf %42, %43 : vector<8x128xf32>
    %45 = math.tanh %44 : vector<8x128xf32>
    %46 = arith.mulf %39, %45 : vector<8x128xf32>
    %c0_24 = arith.constant 0 : index
    %c0_25 = arith.constant 0 : index
    %c0_26 = arith.constant 0 : index
    %47 = vector.load %arg7[%c0_24, %c0_25, %c0_26] : memref<1x8x128xf32, #tpu.memory_space<vmem>>, vector<1x8x128xf32>
    %48 = vector.shape_cast %47 : vector<1x8x128xf32> to vector<8x128xf32>
    %49 = vector.shape_cast %44 : vector<8x128xf32> to vector<1x8x128xf32>
    tpu.vector_store %arg7[%c0_24, %c0_25, %c0_26], %49 {strides = array<i32>} : memref<1x8x128xf32, #tpu.memory_space<vmem>>, vector<1x8x128xf32>,
    %c0_27 = arith.constant 0 : index
    %c0_28 = arith.constant 0 : index
    %c0_29 = arith.constant 0 : index
    %50 = vector.load %arg6[%c0_27, %c0_28, %c0_29] : memref<1x8x128xf32, #tpu.memory_space<vmem>>, vector<1x8x128xf32>
    %51 = vector.shape_cast %50 : vector<1x8x128xf32> to vector<8x128xf32>
    %52 = vector.shape_cast %46 : vector<8x128xf32> to vector<1x8x128xf32>
    tpu.vector_store %arg6[%c0_27, %c0_28, %c0_29], %52 {strides = array<i32>} : memref<1x8x128xf32, #tpu.memory_space<vmem>>, vector<1x8x128xf32>,
    %c1_i32 = arith.constant 1 : i32
    %53 = arith.addi %arg0, %c1_i32 : i32
    %c2_i32 = arith.constant 2 : i32
    %54 = arith.cmpi slt, %53, %c2_i32 : i32
    %55 = arith.extui %54 : i1 to i32
    %c0_i32_30 = arith.constant 0 : i32
    %56 = arith.cmpi ne, %55, %c0_i32_30 : i32
    scf.if %56 {
      %c0_31 = arith.constant 0 : index
      %c0_32 = arith.constant 0 : index
      %57 = vector.load %arg8[%c0_31, %c0_32] : memref<8x384xf32, #tpu.memory_space<vmem>>, vector<8x128xf32>
      tpu.vector_store %arg8[%c0_31, %c0_32], %46 {strides = array<i32>} : memref<8x384xf32, #tpu.memory_space<vmem>>, vector<8x128xf32>,
      %cst_33 = arith.constant 0.000000e+00 : f32
      %58 = vector.broadcast %cst_33 : f32 to vector<8x128xf32>
      %c0_34 = arith.constant 0 : index
      %c128 = arith.constant 128 : index
      %59 = vector.load %arg8[%c0_34, %c128] : memref<8x384xf32, #tpu.memory_space<vmem>>, vector<8x128xf32>
      tpu.vector_store %arg8[%c0_34, %c128], %58 {strides = array<i32>} : memref<8x384xf32, #tpu.memory_space<vmem>>, vector<8x128xf32>,
    } else {
    }
    return
  }
  func.func @transform_0(%arg0: i32) -> (i32, i32) {
    %c0_i32 = arith.constant 0 : i32
    %c0_i32_0 = arith.constant 0 : i32
    %c0_i32_1 = arith.constant 0 : i32
    return %c0_i32, %c0_i32_0 : i32, i32
  }
  func.func @transform_1(%arg0: i32) -> (i32, i32, i32) {
    %c0_i32 = arith.constant 0 : i32
    %c0_i32_0 = arith.constant 0 : i32
    %c0_i32_1 = arith.constant 0 : i32
    return %arg0, %c0_i32, %c0_i32_0 : i32, i32, i32
  }
  func.func @transform_2(%arg0: i32) -> (i32, i32, i32) {
    %c0_i32 = arith.constant 0 : i32
    %c0_i32_0 = arith.constant 0 : i32
    %c0_i32_1 = arith.constant 0 : i32
    return %arg0, %c0_i32, %c0_i32_0 : i32, i32, i32
  }
  func.func @transform_3(%arg0: i32) -> (i32, i32, i32) {
    %c0_i32 = arith.constant 0 : i32
    %c0_i32_0 = arith.constant 0 : i32
    %c0_i32_1 = arith.constant 0 : i32
    return %arg0, %c0_i32, %c0_i32_0 : i32, i32, i32
  }
  func.func @transform_4(%arg0: i32) -> (i32, i32, i32) {
    %c0_i32 = arith.constant 0 : i32
    %c0_i32_0 = arith.constant 0 : i32
    %c0_i32_1 = arith.constant 0 : i32
    return %arg0, %c0_i32, %c0_i32_0 : i32, i32, i32
  }
  func.func @transform_5(%arg0: i32) -> (i32, i32, i32) {
    %c0_i32 = arith.constant 0 : i32
    %c0_i32_0 = arith.constant 0 : i32
    %c0_i32_1 = arith.constant 0 : i32
    return %arg0, %c0_i32, %c0_i32_0 : i32, i32, i32
  }
  func.func @transform_6(%arg0: i32) -> (i32, i32, i32) {
    %c0_i32 = arith.constant 0 : i32
    %c0_i32_0 = arith.constant 0 : i32
    %c0_i32_1 = arith.constant 0 : i32
    return %arg0, %c0_i32, %c0_i32_0 : i32, i32, i32
  }
}

</mosaic_0001>

<bundles_post_ra>
// kernel: tpu_custom_call.1
= control target key start
LH: loop header
LB: loop body
LE: loop exit
PB: predicated region body
PF: predicated region fallthrough
CT: control target
= control target key end

     0   :  { %s2325_s0 = inlined_call_operand.hbm [shape: f32[8,256], index: 0, kind: input, shape index: {}]   ;;  %s2326_s1 = inlined_call_operand.hbm [shape: f32[2,8,128], index: 1, kind: input, shape index: {}]   ;;  %s2327_s2 = inlined_call_operand.hbm [shape: f32[2,8,128], index: 2, kind: input, shape index: {}]   ;;  %s2328_s3 = inlined_call_operand.hbm [shape: f32[2,384,512], index: 3, kind: input, shape index: {}]   ;;  %s2329_s4 = inlined_call_operand.hbm [shape: f32[2,1,512], index: 4, kind: input, shape index: {}]   ;;  %s2330_s5 = inlined_call_operand.hbm [shape: f32[2,8,128], index: 5, kind: output, shape index: {0}]   ;;  %s2331_s6 = inlined_call_operand.hbm [shape: f32[2,8,128], index: 6, kind: output, shape index: {1}]  }
   0x1   :  { %2343 = sst [smem:[#allocation22_spill]] %s2326_s1 }
   0x2   :  { %2344 = sst [smem:[#allocation23_spill]] %s2328_s3 }
   0x3   :  { %12 = vsyncpa [#allocation4], 0 }
   0x4   :  { %13 = vsyncpa [#allocation7], 0 }
   0x5   :  { %15 = vsyncpa [#allocation7 + $0x1], 0 }
   0x6   :  { %16 = vsyncpa [#allocation10], 0 }
   0x7   :  { %18 = vsyncpa [#allocation10 + $0x1], 0 }
   0x8   :  { %19 = vsyncpa [#allocation5], 0 }
   0x9   :  { %21 = vsyncpa [#allocation5 + $0x1], 0 }
   0xa   :  { %22 = vsyncpa [#allocation14], 0 }
   0xb   :  { %24 = vsyncpa [#allocation14 + $0x1], 0  ;;  %s1772_s21 = smov 0   ;;  %s1774_s22 = smov 0  }
   0xc   :  { %s1776_s23 = smov 0   ;;  %s1778_s24 = smov 0  }
   0xd LB: > { %2345 = sst [smem:[#allocation20_spill]] %s1720_s23  ;;  %s1793_s25 = sadd.s32 1, %s1724_s24   ;;  %s1724_s24 = sphi %s1778_s24, %s2375_s24   ;;  %s1720_s23 = sphi %s1776_s23, %s2372_s23   ;;  %s1716_s22 = sphi %s1774_s22, %s2374_s22   ;;  %s1712_s21 = sphi %s1772_s21, %s2373_s21  }
   0xe   : > { %s58_s26 = sadd.s32 1, %s1720_s23  ;;  %s55_s27 = ssub.s32 %s1724_s24, %s1793_s25 }
   0xf   : > { %p2332_p0 = scmp.ne.s32.totalorder %s1720_s23, %s1716_s22  ;;  %p56_p1 = scmp.eq.s32.totalorder %s55_s27, 0 }
  0x10   : > { %p66_p2 = scmp.eq.s32.totalorder %s1724_s24, 0  ;;  %p1420_p4 = scmp.lt.s32.totalorder %s1724_s24, 2 }
  0x11   : > { %s1804_s28 = scalar_select %p56_p1, %s1720_s23, %s58_s26  }
  0x12   : > { %p67_p5 = por %p66_p2, %p2332_p0  ;;  %s236_s29 = sand.u32 1, %s1724_s24  }
  0x13   : > { %2346 = sst [smem:[#allocation21_spill]] %s1804_s28  ;;  %s1811_s30 = sand.u32 1, %s1720_s23  }
  0x14   : > { %s1152_s7 = sshll.u32 %s1811_s30, 3  ;;  %s1153_s8 = sshll.u32 %s1724_s24, 7 }
  0x15   : > { %s2347_s1 = sld [smem:[#allocation22_spill]]  ;;  %s240_s12 = scalar_lea.vmem [#allocation6], %s1152_s7 }
  0x16   : > { %s247_s13 = sshll.u32 %s240_s12, 4  ;;  %p1822_p6 = pnand %p1420_p4, %p67_p5  ;;  %s1826_s13 = int_to_ptr.vmem [resolvable:$true] %s247_s13 }
  0x17   : > { %s1831_s17 = scalar_lea.hbm %s2327_s2, %s1153_s8  ;;  %s1835_s18 = scalar_lea.sflag [#allocation7], %s236_s29 }
  0x18   : > { %s2348_s14 = scalar_select %p1822_p6, 1, 0 }
  0x19   : > { %p1841_p8 = pneg %p1822_p6 }
  0x1b   : > { %s1818_s11 = scalar_lea.hbm %s2347_s1, %s1153_s8  ;;  %s1475_s9 = scalar_lea.hbm %s2347_s1, 256 }
  0x1c   : > { %s1470_s19 = scalar_lea.hbm %s1818_s11, 128  ;;  %p1476_p11 = scmp.lt.u32.totalorder %s1818_s11, %s2347_s1 }
  0x1d   : > { %p1471_p7 = scmp.ne.s32.totalorder %s1818_s11, %s1470_s19  ;;  %p1477_p12 = scmp.lt.u32.totalorder %s1475_s9, %s1470_s19 }
  0x1e   : > { %s2349_s20 = scalar_select %p1841_p8, 1, 0 }
  0x1f   : > { %p1473_p9 = pnand %p1841_p8, %p1471_p7  ;;  %p1478_p13 = por %p1477_p12, %p1476_p11 }
  0x20   : > { %p1479_p1 = scmp.lt.u32.totalorder %s1470_s19, %s1818_s11 }
  0x21   : > { %p1474_p10 = pneg %p1473_p9 }
  0x22   : > { %p1480_p2 = por %p1479_p1, %p1478_p13 }
  0x24   : > { %p1481_p4 = pnand %p1480_p2, %p1474_p10 }
  0x26   : > { %1484 = shalt.err (!%p1481_p4)
}
  0x27   : > { %s1485_s12 = scalar_lea.vmem %s1826_s13, 128  ;;  %s1726_s15 = smov [#allocation6]  }
  0x28   : > { %p1486_p5 = scmp.ne.s32.totalorder %s1826_s13, %s1485_s12  ;;  %s1490_s16 = sshll.u32 %s1726_s15, 4  ;;  %s1491_s16 = int_to_ptr.vmem [resolvable:$false] %s1490_s16 }
  0x29   : > { %s1492_s26 = scalar_lea.vmem %s1491_s16, 256  ;;  %p1493_p3 = scmp.lt.s32.totalorder %s1826_s13, %s1491_s16 }
  0x2a   : > { %p1488_p7 = pnand %p1486_p5, %p1841_p8  ;;  %p1494_p0 = scmp.lt.s32.totalorder %s1492_s26, %s1485_s12 }
  0x2c   : > { %p1489_p9 = pneg %p1488_p7  ;;  %p1495_p11 = por %p1494_p0, %p1493_p3 }
  0x2e   : > { %p1496_p12 = pnand %p1495_p11, %p1489_p9 }
  0x30   : > { %1499 = shalt.err (!%p1496_p12)
}
  0x31   : > { %1402 = dma.hbm_to_vmem [thread:$0]  (!%p1822_p6), %s1818_s11, 128, %s1826_s13, %s1835_s18  }
  0x32   : > { %s1376_s19 = smul.u32 1536, %s1811_s30  ;;  %s2350_s3 = sld [smem:[#allocation23_spill]] }
  0x33   : > { %s1377_s27 = smul.u32 24576, %s1724_s24  ;;  %s1876_s16 = scalar_lea.sflag [#allocation10], %s236_s29 }
  0x34   : > { %s276_s12 = scalar_lea.vmem [#allocation9], %s1376_s19 }
  0x35   : > { %s283_s15 = sshll.u32 %s276_s12, 4  ;;  %s1872_s15 = int_to_ptr.vmem [resolvable:$true] %s283_s15 }
  0x38   : > { %s1870_s10 = scalar_lea.hbm %s2350_s3, %s1377_s27  ;;  %s1505_s27 = scalar_lea.hbm %s2350_s3, 49152 }
  0x39   : > { %s1500_s26 = scalar_lea.hbm %s1870_s10, 24576  ;;  %p1506_p13 = scmp.lt.u32.totalorder %s1870_s10, %s2350_s3 }
  0x3a   : > { %p1501_p0 = scmp.ne.s32.totalorder %s1870_s10, %s1500_s26  ;;  %p1507_p1 = scmp.lt.u32.totalorder %s1505_s27, %s1500_s26 }
  0x3b   : > { %p1509_p4 = scmp.lt.u32.totalorder %s1500_s26, %s1870_s10 }
  0x3c   : > { %p1503_p3 = pnand %p1501_p0, %p1841_p8  ;;  %p1508_p2 = por %p1507_p1, %p1506_p13 }
  0x3e   : > { %p1504_p10 = pneg %p1503_p3  ;;  %p1510_p5 = por %p1509_p4, %p1508_p2 }
  0x40   : > { %p1511_p7 = pnand %p1510_p5, %p1504_p10 }
  0x42   : > { %1514 = shalt.err (!%p1511_p7)
}
  0x43   : > { %s1515_s29 = scalar_lea.vmem %s1872_s15, 24576  ;;  %s1727_s19 = smov [#allocation9]  }
  0x44   : > { %p1516_p9 = scmp.ne.s32.totalorder %s1872_s15, %s1515_s29  ;;  %s1520_s12 = sshll.u32 %s1727_s19, 4  ;;  %s1521_s12 = int_to_ptr.vmem [resolvable:$false] %s1520_s12 }
  0x45   : > { %s1522_s11 = scalar_lea.vmem %s1521_s12, 49152  ;;  %p1523_p0 = scmp.lt.s32.totalorder %s1872_s15, %s1521_s12 }
  0x46   : > { %p1518_p11 = pnand %p1516_p9, %p1841_p8  ;;  %p1524_p3 = scmp.lt.s32.totalorder %s1522_s11, %s1515_s29 }
  0x48   : > { %p1519_p12 = pneg %p1518_p11  ;;  %p1525_p13 = por %p1524_p3, %p1523_p0 }
  0x4a   : > { %p1526_p1 = pnand %p1525_p13, %p1519_p12 }
  0x4c   : > { %1529 = shalt.err (!%p1526_p1)
}
  0x4d   : > { %s1728_s26 = smov 512   ;;  %s1729_s13 = smov 32  }
  0x4e   : > { %1408 = dma.hbm_to_vmem [thread:$0]  (!%p1822_p6), %s1870_s10, 24576, %s1872_s15, %s1876_s16, %s1728_s26, %s1728_s26, %s1729_s13  }
  0x4f   : > { %s1901_s27 = sadd.s32 4294967295, %s1724_s24   ;;  %s1148_s9 = sadd.s32 4294967294, %s1724_s24  }
  0x50   : > { %p71_p10 = scmp.ne.s32.totalorder %s1716_s22, %s1712_s21  ;;  %p2334_p2 = scmp.eq.s32.totalorder %s1901_s27, 0 }
  0x51   : > { %p173_p4 = scmp.eq.s32.totalorder %s1901_s27, 1  ;;  %p179_p5 = scmp.eq.s32.totalorder %s1148_s9, 1 }
  0x52   : > { %p1149_p7 = scmp.ge.s32.totalorder %s1724_s24, 1  ;;  %p1911_p9 = por %p2334_p2, %p71_p10 }
  0x53   : > { %p2352_p11 = scmp.ne.s32.totalorder %s1720_s23, %s1716_s22  ;;  %p1922_p0 = por %p179_p5, %p71_p10 }
  0x54   : > { %s2351_s8 = scalar_select %p1911_p9, 1, 0 }
  0x55   : > { %p1918_p12 = por %p173_p4, %p2352_p11  ;;  %p212_p3 = scmp.lt.s32.totalorder %s1724_s24, 3 }
  0x56   : > { %s2354_s15 = scalar_select %p1922_p0, 1, 0 }
  0x57   : > { %s2353_s10 = scalar_select %p1918_p12, 1, 0 }
  0x58   : > { %p1928_p1 = pnand %p1149_p7, %p212_p3  ;;  %s1730_s19 = smov [#allocation3]  }
  0x59   : > { %s225_s12 = sshll.u32 %s1730_s19, 4  ;;  %s258_s11 = scalar_lea.vmem [#allocation8], %s1152_s7  ;;  %s1932_s12 = int_to_ptr.vmem [resolvable:$true] %s225_s12 }
  0x5a   : > { %s2355_s29 = scalar_select %p1928_p1, 1, 0 }
  0x5b   : > { %s265_s26 = sshll.u32 %s258_s11, 4  ;;  %s1530_s13 = scalar_lea.hbm %s1831_s17, 128  ;;  %s266_s26 = int_to_ptr.vmem [resolvable:$true] %s265_s26 }
  0x5c   : > { %p1531_p4 = scmp.ne.s32.totalorder %s1831_s17, %s1530_s13  ;;  %s1535_s3 = scalar_lea.hbm %s2327_s2, 256 }
  0x5d   : > { %p1536_p11 = scmp.lt.u32.totalorder %s1831_s17, %s2327_s2  ;;  %p1537_p3 = scmp.lt.u32.totalorder %s1535_s3, %s1530_s13 }
  0x5e   : > { %p1533_p5 = pnand %p1531_p4, %p1841_p8  ;;  %p1539_p2 = scmp.lt.u32.totalorder %s1530_s13, %s1831_s17 }
  0x5f   : > { %p1538_p13 = por %p1537_p3, %p1536_p11 }
  0x60   : > { %p1534_p7 = pneg %p1533_p5 }
  0x61   : > { %p1540_p0 = por %p1539_p2, %p1538_p13 }
  0x63   : > { %p1541_p12 = pnand %p1540_p0, %p1534_p7 }
  0x65   : > { %1544 = shalt.err (!%p1541_p12)
}
  0x66   : > { %s1545_s7 = scalar_lea.vmem %s266_s26, 128  ;;  %s1731_s19 = smov [#allocation8]  }
  0x67   : > { %p1546_p10 = scmp.ne.s32.totalorder %s266_s26, %s1545_s7  ;;  %s1550_s11 = sshll.u32 %s1731_s19, 4  ;;  %s1551_s11 = int_to_ptr.vmem [resolvable:$false] %s1550_s11 }
  0x68   : > { %s1552_s1 = scalar_lea.vmem %s1551_s11, 256  ;;  %p1553_p9 = scmp.lt.s32.totalorder %s266_s26, %s1551_s11 }
  0x69   : > { %p1548_p4 = pnand %p1546_p10, %p1841_p8  ;;  %p1554_p1 = scmp.lt.s32.totalorder %s1552_s1, %s1545_s7 }
  0x6b   : > { %p1549_p5 = pneg %p1548_p4  ;;  %p1555_p6 = por %p1554_p1, %p1553_p9 }
  0x6d   : > { %p1556_p3 = pnand %p1555_p6, %p1549_p5 }
  0x6f   : > { %1559 = shalt.err (!%p1556_p3)
}
  0x70   : > { %p2356_p11 = scmp.ne.s32.totalorder %s2348_s14, 0  ;;  %p2357_p2 = scmp.eq.s32.totalorder %s1901_s27, 0 }
  0x71   : > { %p2358_p12 = scmp.ne.s32.totalorder %s2355_s29, 0  ;;  %s1157_s23 = sshll.u32 %s1811_s30, 2 }
  0x72   : > { %1405 = dma.hbm_to_vmem [thread:$0]  (!%p2356_p11), %s1831_s17, 128, %s266_s26, %s1835_s18  }
  0x73   : > { %p2359_p0 = pneg %p2358_p12  ;;  %s1175_s28 = sshll.u32 %s1724_s24, 6 }
  0x74   : > { %s1970_s7 = scalar_lea.hbm %s2329_s4, %s1175_s28  ;;  %s1560_s1 = scalar_lea.hbm %s2325_s0, 256 }
  0x75   : > { %p1961_p13 = pnand %p2359_p0, %p2357_p2  ;;  %p1561_p6 = scmp.ne.s32.totalorder %s2325_s0, %s1560_s1 }
  0x76   : > { %p1567_p7 = scmp.lt.u32.totalorder %s1560_s1, %s2325_s0 }
  0x77   : > { %p1562_p9 = pneg %p1961_p13 }
  0x79   : > { %p1563_p1 = pnand %p1562_p9, %p1561_p6 }
  0x7b   : > { %p1564_p10 = pneg %p1563_p1 }
  0x7d   : > { %p1569_p4 = pnand %p1567_p7, %p1564_p10 }
  0x7f   : > { %1572 = shalt.err (!%p1569_p4)
}
  0x80   : > { %s1573_s28 = scalar_lea.vmem %s1932_s12, 256  ;;  %p1581_p0 = scmp.lt.s32.totalorder %s1932_s12, %s1932_s12 }
  0x81   : > { %p1574_p5 = scmp.ne.s32.totalorder %s1932_s12, %s1573_s28  ;;  %p1582_p12 = scmp.lt.s32.totalorder %s1573_s28, %s1573_s28 }
  0x83   : > { %p1576_p3 = pnand %p1574_p5, %p1562_p9  ;;  %p1583_p11 = por %p1582_p12, %p1581_p0 }
  0x85   : > { %p1577_p2 = pneg %p1576_p3 }
  0x87   : > { %p1584_p8 = pnand %p1583_p11, %p1577_p2 }
  0x89   : > { %1587 = shalt.err (!%p1584_p8)
}
  0x8a   : > { %1398 = dma.hbm_to_vmem [thread:$0]  (!%p1961_p13), %s2325_s0, 256, %s1932_s12, [#allocation4]  }
  0x8b   : > { %s297_s19 = scalar_lea.vmem [#allocation11], %s1157_s23  ;;  %s1588_s1 = scalar_lea.hbm %s1970_s7, 64 }
  0x8c   : > { %s305_s11 = sshll.u32 %s297_s19, 4  ;;  %p1589_p6 = scmp.ne.s32.totalorder %s1970_s7, %s1588_s1  ;;  %s306_s11 = int_to_ptr.vmem [resolvable:$true] %s305_s11 }
  0x8d   : > { %p2361_p12 = scmp.ne.s32.totalorder %s2349_s20, 0  ;;  %s1593_s18 = scalar_lea.hbm %s2329_s4, 128 }
  0x8e   : > { %p1594_p9 = scmp.lt.u32.totalorder %s1970_s7, %s2329_s4  ;;  %p1595_p1 = scmp.lt.u32.totalorder %s1593_s18, %s1588_s1 }
  0x8f   : > { %p1591_p11 = pnand %p1589_p6, %p2361_p12  ;;  %p1597_p7 = scmp.lt.u32.totalorder %s1588_s1, %s1970_s7 }
  0x90   : > { %p1596_p10 = por %p1595_p1, %p1594_p9 }
  0x91   : > { %p1592_p8 = pneg %p1591_p11 }
  0x92   : > { %p1598_p13 = por %p1597_p7, %p1596_p10 }
  0x94   : > { %p1599_p4 = pnand %p1598_p13, %p1592_p8 }
  0x96   : > { %1602 = shalt.err (!%p1599_p4)
}
  0x97   : > { %s1603_s12 = scalar_lea.vmem %s306_s11, 64  ;;  %s1732_s23 = smov [#allocation11]  }
  0x98   : > { %p1604_p5 = scmp.ne.s32.totalorder %s306_s11, %s1603_s12  ;;  %s1608_s28 = sshll.u32 %s1732_s23, 4  ;;  %s1609_s28 = int_to_ptr.vmem [resolvable:$false] %s1608_s28 }
  0x99   : > { %s1610_s13 = scalar_lea.vmem %s1609_s28, 128  ;;  %p1611_p0 = scmp.lt.s32.totalorder %s306_s11, %s1609_s28 }
  0x9a   : > { %p1606_p3 = pnand %p1604_p5, %p2361_p12  ;;  %p1612_p6 = scmp.lt.s32.totalorder %s1610_s13, %s1603_s12 }
  0x9c   : > { %p1607_p2 = pneg %p1606_p3  ;;  %p1613_p11 = por %p1612_p6, %p1611_p0 }
  0x9e   : > { %p1614_p1 = pnand %p1613_p11, %p1607_p2 }
  0xa0   : > { %1617 = shalt.err (!%p1614_p1)
}
  0xa1   : > { %p2362_p9 = scmp.ne.s32.totalorder %s2348_s14, 0  ;;  %p2363_p8 = scmp.ne.s32.totalorder %s2355_s29, 0 }
  0xa2   : > { %p2364_p12 = scmp.eq.s32.totalorder (!%p2363_p8), %s1901_s27, 0 }
  0xa3   : > { %1411 = dma.hbm_to_vmem [thread:$0]  (!%p2362_p9), %s1970_s7, 64, %s306_s11, %s1876_s16  }
  0xa4   : > { %314 = sbr.rel (%p2363_p8) target bundleno = 591 (0x24f), region = 40 }
  0xab   : > { %1691 = dma.done.wait (%p2364_p12), [#allocation4], 256   ;;  %p2365_p10 = pmov %p2364_p12 }
  0xac   : > { %s320_s20 = sand.u32 1, %s1901_s27   ;;  %s2019_s9 = sand.u32 1, %s1716_s22  }
  0xad   : > { %1693 = vsyncadd (%p2365_p10), [#allocation4], 4294967040  ;;  %s2022_s14 = sshll.u32 %s2019_s9, 3  ;;  %s321_s16 = scalar_lea.sflag [#allocation7], %s320_s20 }
  0xae   : > { %s324_s7 = scalar_lea.vmem [#allocation6], %s2022_s14  ;;  %p2366_p7 = scmp.ne.s32.totalorder %s2351_s8, 0 }
  0xb0   : > { %1695 = dma.done.wait (%p2366_p7), %s321_s16, 256  }
  0xb1   : > { %1697 = vsyncadd (%p2366_p7), %s321_s16, 4294967040  ;;  %s1378_s29 = smul.u32 1536, %s2019_s9  ;;  %s333_s19 = scalar_lea.vmem [#allocation8], %s2022_s14 }
  0xb2   : > { %s339_s11 = scalar_lea.sflag [#allocation10], %s320_s20 }
  0xb3   : > { %s2031_s1 = scalar_lea.vmem [#allocation9], %s1378_s29 }
  0xb4   : > { %1699 = dma.done.wait (%p2366_p7), %s339_s11, 24640  }
  0xb5   : > { %1701 = vsyncadd (%p2366_p7), %s339_s11, 4294942656  ;;  %s1164_s17 = sshll.u32 %s2019_s9, 2  ;;  %s392_s18 = scalar_lea.vmem [#allocation12], %s2022_s14 }
  0xb6   : > { %s2038_s3 = scalar_lea.vmem [#allocation11], %s1164_s17  ;;  %s399_s26 = scalar_lea.vmem [#allocation13], %s2022_s14 }
  0xb7   : > { %p2367_p13 = scmp.ne.s32.totalorder %s1901_s27, 0 }
  0xb8   : > { %v404_v0 = vld [vmem:[#allocation3] sm:$0xff] (!%p2367_p13)  ;;  %v405_v1 = vld [vmem:[#allocation3 + $0x8] sm:$0xff] (!%p2367_p13) }
  0xb9   : > { %403 = sbr.rel (%p2367_p13) target bundleno = 192 (0xc0), region = 64  ;;  %406 = vst [vmem:[#allocation2] sm:$0xff] (!%p2367_p13), %v404_v0  ;;  %407 = vst [vmem:[#allocation2 + $0x8] sm:$0xff] (!%p2367_p13), %v405_v1 }
  0xc0 PF: > { %v411_v2 = vld [vmem:[%s2031_s1 + $0x8] sm:$0xff]  ;;  %v413_v4 = vld [vmem:[%s2031_s1 + $0x18] sm:$0xff]  ;;  %v410_v7 = vld [vmem:[%s2031_s1] sm:$0xff]  ;;  %s932_s8 = sadd.s32 1, %s1901_s27 }
  0xc1   : > { %v415_v3 = vld [vmem:[%s2031_s1 + $0x28] sm:$0xff]  ;;  %v417_v6 = vld [vmem:[%s2031_s1 + $0x38] sm:$0xff]  ;;  %v414_v8 = vld [vmem:[%s2031_s1 + $0x20] sm:$0xff]  ;;  %p1168_p4 = scmp.ge.s32.totalorder %s932_s8, 2 }
  0xc2   : > { %v1176_v5 = vpack.c.bf16 %v415_v3, %v411_v2  ;;  %v1272_v9 = vpack.c.bf16 %v417_v6, %v413_v4  ;;  %v1178_v10 = vpack.c.bf16 %v414_v8, %v410_v7  ;;  %v412_v11 = vld [vmem:[%s2031_s1 + $0x10] sm:$0xff]  ;;  %v419_v13 = vld [vmem:[%s2031_s1 + $0x48] sm:$0xff]  ;;  %v421_v16 = vld [vmem:[%s2031_s1 + $0x58] sm:$0xff] }
  0xc3   : > { %v416_v12 = vld [vmem:[%s2031_s1 + $0x30] sm:$0xff]  ;;  %v423_v15 = vld [vmem:[%s2031_s1 + $0x68] sm:$0xff]  ;;  %v425_v17 = vld [vmem:[%s2031_s1 + $0x78] sm:$0xff] }
  0xc4   : > { %1177 = vmatprep.subr.bf16.mxu0 %v1176_v5  ;;  %v1274_v14 = vpack.c.bf16 %v416_v12, %v412_v11  ;;  %1273 = vmatprep.subr.bf16.mxu1 %v1272_v9  ;;  %v1180_v18 = vpack.c.bf16 %v423_v15, %v419_v13  ;;  %v1276_v19 = vpack.c.bf16 %v425_v17, %v421_v16  ;;  %v418_v20 = vld [vmem:[%s2031_s1 + $0x40] sm:$0xff]  ;;  %v420_v22 = vld [vmem:[%s2031_s1 + $0x50] sm:$0xff]  ;;  %v427_v25 = vld [vmem:[%s2031_s1 + $0x88] sm:$0xff] }
  0xc5   : > { %1179 = vmatpush1.bf16.msra.mxu0 %v1178_v10  ;;  %v422_v21 = vld [vmem:[%s2031_s1 + $0x60] sm:$0xff]  ;;  %v424_v24 = vld [vmem:[%s2031_s1 + $0x70] sm:$0xff]  ;;  %v431_v26 = vld [vmem:[%s2031_s1 + $0xa8] sm:$0xff] }
  0xc6   : > { %1275 = vmatpush1.bf16.msra.mxu1 %v1274_v14  ;;  %v1182_v23 = vpack.c.bf16 %v422_v21, %v418_v20  ;;  %1181 = vmatprep.subr.bf16.mxu0 %v1180_v18  ;;  %v1278_v27 = vpack.c.bf16 %v424_v24, %v420_v22  ;;  %v1184_v28 = vpack.c.bf16 %v431_v26, %v427_v25  ;;  %v429_v29 = vld [vmem:[%s2031_s1 + $0x98] sm:$0xff]  ;;  %v426_v31 = vld [vmem:[%s2031_s1 + $0x80] sm:$0xff]  ;;  %v428_v34 = vld [vmem:[%s2031_s1 + $0x90] sm:$0xff] }
  0xc7   : > { %1277 = vmatprep.subr.bf16.mxu1 %v1276_v19  ;;  %v433_v30 = vld [vmem:[%s2031_s1 + $0xb8] sm:$0xff]  ;;  %v430_v33 = vld [vmem:[%s2031_s1 + $0xa0] sm:$0xff]  ;;  %v432_v35 = vld [vmem:[%s2031_s1 + $0xb0] sm:$0xff] }
  0xc8   : > { %v1280_v32 = vpack.c.bf16 %v433_v30, %v429_v29  ;;  %v1186_v36 = vpack.c.bf16 %v430_v33, %v426_v31  ;;  %v435_v37 = vld [vmem:[%s2031_s1 + $0xc8] sm:$0xff]  ;;  %v437_v39 = vld [vmem:[%s2031_s1 + $0xd8] sm:$0xff]  ;;  %v1282_v40 = vpack.c.bf16 %v432_v35, %v428_v34  ;;  %v434_v43 = vld [vmem:[%s2031_s1 + $0xc0] sm:$0xff] }
  0xc9   : > { %1183 = vmatpush1.bf16.msra.mxu0 %v1182_v23  ;;  %v439_v38 = vld [vmem:[%s2031_s1 + $0xe8] sm:$0xff]  ;;  %v441_v42 = vld [vmem:[%s2031_s1 + $0xf8] sm:$0xff]  ;;  %v438_v44 = vld [vmem:[%s2031_s1 + $0xe0] sm:$0xff] }
  0xca   : > { %1279 = vmatpush1.bf16.msra.mxu1 %v1278_v27  ;;  %1185 = vmatprep.subr.bf16.mxu0 %v1184_v28  ;;  %v1188_v41 = vpack.c.bf16 %v439_v38, %v435_v37  ;;  %v1284_v45 = vpack.c.bf16 %v441_v42, %v437_v39  ;;  %v436_v46 = vld [vmem:[%s2031_s1 + $0xd0] sm:$0xff]  ;;  %v443_v48 = vld [vmem:[%s2031_s1 + $0x108] sm:$0xff]  ;;  %v445_v50 = vld [vmem:[%s2031_s1 + $0x118] sm:$0xff]  ;;  %v1190_v52 = vpack.c.bf16 %v438_v44, %v434_v43 }
  0xcb   : > { %1281 = vmatprep.subr.bf16.mxu1 %v1280_v32  ;;  %v440_v47 = vld [vmem:[%s2031_s1 + $0xf0] sm:$0xff]  ;;  %v447_v49 = vld [vmem:[%s2031_s1 + $0x128] sm:$0xff]  ;;  %v449_v51 = vld [vmem:[%s2031_s1 + $0x138] sm:$0xff] }
  0xcc   : > { %v1286_v53 = vpack.c.bf16 %v440_v47, %v436_v46  ;;  %v1192_v54 = vpack.c.bf16 %v447_v49, %v443_v48  ;;  %v442_v55 = vld [vmem:[%s2031_s1 + $0x100] sm:$0xff]  ;;  %v444_v57 = vld [vmem:[%s2031_s1 + $0x110] sm:$0xff]  ;;  %v1288_v58 = vpack.c.bf16 %v449_v51, %v445_v50  ;;  %v451_v60 = vld [vmem:[%s2031_s1 + $0x148] sm:$0xff] }
  0xcd   : > { %1187 = vmatpush1.bf16.msra.mxu0 %v1186_v36  ;;  %v446_v56 = vld [vmem:[%s2031_s1 + $0x120] sm:$0xff]  ;;  %v448_v59 = vld [vmem:[%s2031_s1 + $0x130] sm:$0xff]  ;;  %v455_v61 = vld [vmem:[%s2031_s1 + $0x168] sm:$0xff] }
  0xce   : > { %1283 = vmatpush1.bf16.msra.mxu1 %v1282_v40  ;;  %1189 = vmatprep.subr.bf16.mxu0 %v1188_v41  ;;  %v453_v62 = vld [vmem:[%s2031_s1 + $0x158] sm:$0xff]  ;;  %v1194_v0 = vpack.c.bf16 %v446_v56, %v442_v55  ;;  %v1290_v1 = vpack.c.bf16 %v448_v59, %v444_v57  ;;  %v1196_v2 = vpack.c.bf16 %v455_v61, %v451_v60  ;;  %v450_v3 = vld [vmem:[%s2031_s1 + $0x140] sm:$0xff]  ;;  %v452_v5 = vld [vmem:[%s2031_s1 + $0x150] sm:$0xff] }
  0xcf   : > { %1285 = vmatprep.subr.bf16.mxu1 %v1284_v45  ;;  %v457_v63 = vld [vmem:[%s2031_s1 + $0x178] sm:$0xff]  ;;  %v454_v4 = vld [vmem:[%s2031_s1 + $0x160] sm:$0xff]  ;;  %v456_v7 = vld [vmem:[%s2031_s1 + $0x170] sm:$0xff] }
  0xd0   : > { %v1292_v6 = vpack.c.bf16 %v457_v63, %v453_v62  ;;  %v459_v8 = vld [vmem:[%s2031_s1 + $0x188] sm:$0xff]  ;;  %v461_v10 = vld [vmem:[%s2031_s1 + $0x198] sm:$0xff]  ;;  %v1198_v12 = vpack.c.bf16 %v454_v4, %v450_v3  ;;  %v1294_v13 = vpack.c.bf16 %v456_v7, %v452_v5  ;;  %v458_v15 = vld [vmem:[%s2031_s1 + $0x180] sm:$0xff] }
  0xd1   : > { %1191 = vmatpush1.bf16.msra.mxu0 %v1190_v52  ;;  %v463_v9 = vld [vmem:[%s2031_s1 + $0x1a8] sm:$0xff]  ;;  %v465_v11 = vld [vmem:[%s2031_s1 + $0x1b8] sm:$0xff]  ;;  %v462_v16 = vld [vmem:[%s2031_s1 + $0x1a0] sm:$0xff] }
  0xd2   : > { %1287 = vmatpush1.bf16.msra.mxu1 %v1286_v53  ;;  %1193 = vmatprep.subr.bf16.mxu0 %v1192_v54  ;;  %v1200_v14 = vpack.c.bf16 %v463_v9, %v459_v8  ;;  %v460_v17 = vld [vmem:[%s2031_s1 + $0x190] sm:$0xff]  ;;  %v1296_v18 = vpack.c.bf16 %v465_v11, %v461_v10  ;;  %v467_v20 = vld [vmem:[%s2031_s1 + $0x1c8] sm:$0xff]  ;;  %v469_v22 = vld [vmem:[%s2031_s1 + $0x1d8] sm:$0xff]  ;;  %v1202_v24 = vpack.c.bf16 %v462_v16, %v458_v15 }
  0xd3   : > { %1289 = vmatprep.subr.bf16.mxu1 %v1288_v58  ;;  %v464_v19 = vld [vmem:[%s2031_s1 + $0x1b0] sm:$0xff]  ;;  %v471_v21 = vld [vmem:[%s2031_s1 + $0x1e8] sm:$0xff]  ;;  %v473_v23 = vld [vmem:[%s2031_s1 + $0x1f8] sm:$0xff] }
  0xd4   : > { %v1298_v25 = vpack.c.bf16 %v464_v19, %v460_v17  ;;  %v1204_v26 = vpack.c.bf16 %v471_v21, %v467_v20  ;;  %v466_v27 = vld [vmem:[%s2031_s1 + $0x1c0] sm:$0xff]  ;;  %v468_v29 = vld [vmem:[%s2031_s1 + $0x1d0] sm:$0xff]  ;;  %v1300_v30 = vpack.c.bf16 %v473_v23, %v469_v22  ;;  %v475_v32 = vld [vmem:[%s2031_s1 + $0x208] sm:$0xff] }
  0xd5   : > { %1195 = vmatpush1.bf16.msra.mxu0 %v1194_v0  ;;  %v470_v28 = vld [vmem:[%s2031_s1 + $0x1e0] sm:$0xff]  ;;  %v472_v31 = vld [vmem:[%s2031_s1 + $0x1f0] sm:$0xff]  ;;  %v479_v33 = vld [vmem:[%s2031_s1 + $0x228] sm:$0xff] }
  0xd6   : > { %1291 = vmatpush1.bf16.msra.mxu1 %v1290_v1  ;;  %1197 = vmatprep.subr.bf16.mxu0 %v1196_v2  ;;  %v477_v34 = vld [vmem:[%s2031_s1 + $0x218] sm:$0xff]  ;;  %v1206_v36 = vpack.c.bf16 %v470_v28, %v466_v27  ;;  %v1302_v37 = vpack.c.bf16 %v472_v31, %v468_v29  ;;  %v1208_v38 = vpack.c.bf16 %v479_v33, %v475_v32  ;;  %v474_v39 = vld [vmem:[%s2031_s1 + $0x200] sm:$0xff]  ;;  %v476_v41 = vld [vmem:[%s2031_s1 + $0x210] sm:$0xff] }
  0xd7   : > { %1293 = vmatprep.subr.bf16.mxu1 %v1292_v6  ;;  %v481_v35 = vld [vmem:[%s2031_s1 + $0x238] sm:$0xff]  ;;  %v478_v40 = vld [vmem:[%s2031_s1 + $0x220] sm:$0xff]  ;;  %v480_v43 = vld [vmem:[%s2031_s1 + $0x230] sm:$0xff] }
  0xd8   : > { %v1304_v42 = vpack.c.bf16 %v481_v35, %v477_v34  ;;  %v483_v44 = vld [vmem:[%s2031_s1 + $0x248] sm:$0xff]  ;;  %v485_v46 = vld [vmem:[%s2031_s1 + $0x258] sm:$0xff]  ;;  %v1210_v48 = vpack.c.bf16 %v478_v40, %v474_v39  ;;  %v1306_v49 = vpack.c.bf16 %v480_v43, %v476_v41  ;;  %v482_v51 = vld [vmem:[%s2031_s1 + $0x240] sm:$0xff] }
  0xd9   : > { %1199 = vmatpush1.bf16.msra.mxu0 %v1198_v12  ;;  %v487_v45 = vld [vmem:[%s2031_s1 + $0x268] sm:$0xff]  ;;  %v489_v47 = vld [vmem:[%s2031_s1 + $0x278] sm:$0xff]  ;;  %v486_v52 = vld [vmem:[%s2031_s1 + $0x260] sm:$0xff] }
  0xda   : > { %1295 = vmatpush1.bf16.msra.mxu1 %v1294_v13  ;;  %1201 = vmatprep.subr.bf16.mxu0 %v1200_v14  ;;  %v1212_v50 = vpack.c.bf16 %v487_v45, %v483_v44  ;;  %v484_v53 = vld [vmem:[%s2031_s1 + $0x250] sm:$0xff]  ;;  %v1308_v54 = vpack.c.bf16 %v489_v47, %v485_v46  ;;  %v491_v56 = vld [vmem:[%s2031_s1 + $0x288] sm:$0xff]  ;;  %v493_v58 = vld [vmem:[%s2031_s1 + $0x298] sm:$0xff]  ;;  %v1214_v60 = vpack.c.bf16 %v486_v52, %v482_v51 }
  0xdb   : > { %1297 = vmatprep.subr.bf16.mxu1 %v1296_v18  ;;  %v488_v55 = vld [vmem:[%s2031_s1 + $0x270] sm:$0xff]  ;;  %v495_v57 = vld [vmem:[%s2031_s1 + $0x2a8] sm:$0xff]  ;;  %v497_v59 = vld [vmem:[%s2031_s1 + $0x2b8] sm:$0xff] }
  0xdc   : > { %v1310_v61 = vpack.c.bf16 %v488_v55, %v484_v53  ;;  %v1216_v62 = vpack.c.bf16 %v495_v57, %v491_v56  ;;  %v490_v63 = vld [vmem:[%s2031_s1 + $0x280] sm:$0xff]  ;;  %v492_v1 = vld [vmem:[%s2031_s1 + $0x290] sm:$0xff]  ;;  %v1312_v2 = vpack.c.bf16 %v497_v59, %v493_v58  ;;  %v499_v4 = vld [vmem:[%s2031_s1 + $0x2c8] sm:$0xff] }
  0xdd   : > { %1203 = vmatpush1.bf16.msra.mxu0 %v1202_v24  ;;  %v494_v0 = vld [vmem:[%s2031_s1 + $0x2a0] sm:$0xff]  ;;  %v496_v3 = vld [vmem:[%s2031_s1 + $0x2b0] sm:$0xff]  ;;  %v503_v5 = vld [vmem:[%s2031_s1 + $0x2e8] sm:$0xff] }
  0xde   : > { %1299 = vmatpush1.bf16.msra.mxu1 %v1298_v25  ;;  %1205 = vmatprep.subr.bf16.mxu0 %v1204_v26  ;;  %v501_v6 = vld [vmem:[%s2031_s1 + $0x2d8] sm:$0xff]  ;;  %v1218_v8 = vpack.c.bf16 %v494_v0, %v490_v63  ;;  %v498_v9 = vld [vmem:[%s2031_s1 + $0x2c0] sm:$0xff]  ;;  %v1314_v10 = vpack.c.bf16 %v496_v3, %v492_v1  ;;  %v1220_v11 = vpack.c.bf16 %v503_v5, %v499_v4  ;;  %v500_v13 = vld [vmem:[%s2031_s1 + $0x2d0] sm:$0xff] }
  0xdf   : > { %1301 = vmatprep.subr.bf16.mxu1 %v1300_v30  ;;  %v505_v7 = vld [vmem:[%s2031_s1 + $0x2f8] sm:$0xff]  ;;  %v502_v12 = vld [vmem:[%s2031_s1 + $0x2e0] sm:$0xff]  ;;  %v504_v14 = vld [vmem:[%s2031_s1 + $0x2f0] sm:$0xff] }
  0xe0   : > { %v1316_v15 = vpack.c.bf16 %v505_v7, %v501_v6  ;;  %v507_v16 = vld [vmem:[%s2031_s1 + $0x308] sm:$0xff]  ;;  %v603_v18 = vld [vmem:[#allocation2 + $0x8] sm:$0xff]  ;;  %v509_v19 = vld [vmem:[%s2031_s1 + $0x318] sm:$0xff]  ;;  %v1222_v21 = vpack.c.bf16 %v502_v12, %v498_v9  ;;  %v1318_v22 = vpack.c.bf16 %v504_v14, %v500_v13 }
  0xe1   : > { %1207 = vmatpush1.bf16.msra.mxu0 %v1206_v36  ;;  %v511_v17 = vld [vmem:[%s2031_s1 + $0x328] sm:$0xff]  ;;  %v513_v20 = vld [vmem:[%s2031_s1 + $0x338] sm:$0xff]  ;;  %691 = vmatprep.mubr.f32.mxu0 %v603_v18  ;;  %v506_v24 = vld [vmem:[%s2031_s1 + $0x300] sm:$0xff] }
  0xe2   : > { %1303 = vmatpush1.bf16.msra.mxu1 %v1302_v37  ;;  %1209 = vmatprep.subr.bf16.mxu0 %v1208_v38  ;;  %v1224_v23 = vpack.c.bf16 %v511_v17, %v507_v16  ;;  %v510_v25 = vld [vmem:[%s2031_s1 + $0x320] sm:$0xff]  ;;  %v508_v26 = vld [vmem:[%s2031_s1 + $0x310] sm:$0xff]  ;;  %v1320_v27 = vpack.c.bf16 %v513_v20, %v509_v19  ;;  %v515_v29 = vld [vmem:[%s2031_s1 + $0x348] sm:$0xff] }
  0xe3   : > { %1305 = vmatprep.subr.bf16.mxu1 %v1304_v42  ;;  %833 = vmatprep.mubr.f32.mxu1 %v603_v18  ;;  %v512_v28 = vld [vmem:[%s2031_s1 + $0x330] sm:$0xff]  ;;  %v519_v30 = vld [vmem:[%s2031_s1 + $0x368] sm:$0xff]  ;;  %v517_v31 = vld [vmem:[%s2031_s1 + $0x358] sm:$0xff]  ;;  %v1226_v33 = vpack.c.bf16 %v510_v25, %v506_v24 }
  0xe4   : > { %v521_v32 = vld [vmem:[%s2031_s1 + $0x378] sm:$0xff]  ;;  %v1322_v34 = vpack.c.bf16 %v512_v28, %v508_v26  ;;  %v1228_v35 = vpack.c.bf16 %v519_v30, %v515_v29  ;;  %v514_v36 = vld [vmem:[%s2031_s1 + $0x340] sm:$0xff]  ;;  %v516_v38 = vld [vmem:[%s2031_s1 + $0x350] sm:$0xff] }
  0xe5   : > { %1211 = vmatpush1.bf16.msra.mxu0 %v1210_v48  ;;  %v518_v37 = vld [vmem:[%s2031_s1 + $0x360] sm:$0xff]  ;;  %v1324_v39 = vpack.c.bf16 %v521_v32, %v517_v31  ;;  %v520_v40 = vld [vmem:[%s2031_s1 + $0x370] sm:$0xff]  ;;  %v523_v41 = vld [vmem:[%s2031_s1 + $0x388] sm:$0xff] }
  0xe6   : > { %1307 = vmatpush1.bf16.msra.mxu1 %v1306_v49  ;;  %1213 = vmatprep.subr.bf16.mxu0 %v1212_v50  ;;  %v527_v42 = vld [vmem:[%s2031_s1 + $0x3a8] sm:$0xff]  ;;  %v525_v43 = vld [vmem:[%s2031_s1 + $0x398] sm:$0xff]  ;;  %v1230_v45 = vpack.c.bf16 %v518_v37, %v514_v36  ;;  %v1326_v46 = vpack.c.bf16 %v520_v40, %v516_v38  ;;  %v522_v48 = vld [vmem:[%s2031_s1 + $0x380] sm:$0xff] }
  0xe7   : > { %1309 = vmatprep.subr.bf16.mxu1 %v1308_v54  ;;  %v529_v44 = vld [vmem:[%s2031_s1 + $0x3b8] sm:$0xff]  ;;  %v1232_v47 = vpack.c.bf16 %v527_v42, %v523_v41  ;;  %v526_v49 = vld [vmem:[%s2031_s1 + $0x3a0] sm:$0xff]  ;;  %v524_v50 = vld [vmem:[%s2031_s1 + $0x390] sm:$0xff]  ;;  %v1733_v41 = vmov 0.0  }
  0xe8   : > { %v1328_v51 = vpack.c.bf16 %v529_v44, %v525_v43  ;;  %v528_v52 = vld [vmem:[%s2031_s1 + $0x3b0] sm:$0xff]  ;;  %v531_v53 = vld [vmem:[%s2031_s1 + $0x3c8] sm:$0xff]  ;;  %v533_v55 = vld [vmem:[%s2031_s1 + $0x3d8] sm:$0xff]  ;;  %v1234_v57 = vpack.c.bf16 %v526_v49, %v522_v48 }
  0xe9   : > { %1215 = vmatpush1.bf16.msra.mxu0 %v1214_v60  ;;  %v535_v54 = vld [vmem:[%s2031_s1 + $0x3e8] sm:$0xff]  ;;  %v537_v56 = vld [vmem:[%s2031_s1 + $0x3f8] sm:$0xff]  ;;  %v1330_v58 = vpack.c.bf16 %v528_v52, %v524_v50  ;;  %v530_v60 = vld [vmem:[%s2031_s1 + $0x3c0] sm:$0xff] }
  0xea   : > { %1311 = vmatpush1.bf16.msra.mxu1 %v1310_v61  ;;  %1217 = vmatprep.subr.bf16.mxu0 %v1216_v62  ;;  %v1236_v59 = vpack.c.bf16 %v535_v54, %v531_v53  ;;  %v534_v61 = vld [vmem:[%s2031_s1 + $0x3e0] sm:$0xff]  ;;  %v532_v62 = vld [vmem:[%s2031_s1 + $0x3d0] sm:$0xff]  ;;  %v1332_v63 = vpack.c.bf16 %v537_v56, %v533_v55  ;;  %v539_v1 = vld [vmem:[%s2031_s1 + $0x408] sm:$0xff] }
  0xeb   : > { %1313 = vmatprep.subr.bf16.mxu1 %v1312_v2  ;;  %v536_v0 = vld [vmem:[%s2031_s1 + $0x3f0] sm:$0xff]  ;;  %v543_v2 = vld [vmem:[%s2031_s1 + $0x428] sm:$0xff]  ;;  %v541_v3 = vld [vmem:[%s2031_s1 + $0x418] sm:$0xff]  ;;  %v1238_v5 = vpack.c.bf16 %v534_v61, %v530_v60 }
  0xec   : > { %v545_v4 = vld [vmem:[%s2031_s1 + $0x438] sm:$0xff]  ;;  %v1334_v6 = vpack.c.bf16 %v536_v0, %v532_v62  ;;  %v1240_v7 = vpack.c.bf16 %v543_v2, %v539_v1  ;;  %v542_v9 = vld [vmem:[%s2031_s1 + $0x420] sm:$0xff]  ;;  %v544_v12 = vld [vmem:[%s2031_s1 + $0x430] sm:$0xff] }
  0xed   : > { %1219 = vmatpush1.bf16.msra.mxu0 %v1218_v8  ;;  %v538_v8 = vld [vmem:[%s2031_s1 + $0x400] sm:$0xff]  ;;  %v547_v13 = vld [vmem:[%s2031_s1 + $0x448] sm:$0xff]  ;;  %v553_v16 = vld [vmem:[%s2031_s1 + $0x478] sm:$0xff] }
  0xee   : > { %1315 = vmatpush1.bf16.msra.mxu1 %v1314_v10  ;;  %1221 = vmatprep.subr.bf16.mxu0 %v1220_v11  ;;  %v540_v10 = vld [vmem:[%s2031_s1 + $0x410] sm:$0xff]  ;;  %v1336_v11 = vpack.c.bf16 %v545_v4, %v541_v3  ;;  %v551_v14 = vld [vmem:[%s2031_s1 + $0x468] sm:$0xff]  ;;  %v602_v17 = vld [vmem:[#allocation2] sm:$0xff]  ;;  %v1242_v18 = vpack.c.bf16 %v542_v9, %v538_v8 }
  0xef   : > { %1317 = vmatprep.subr.bf16.mxu1 %v1316_v15  ;;  %v549_v15 = vld [vmem:[%s2031_s1 + $0x458] sm:$0xff]  ;;  %v2186_v19 = vld [vmem:[%s324_s7] sm:$0xff]  ;;  %v1338_v20 = vpack.c.bf16 %v544_v12, %v540_v10  ;;  %v548_v24 = vld [vmem:[%s2031_s1 + $0x450] sm:$0xff] }
  0xf0   : > { %v1340_v25 = vpack.c.bf16 %v553_v16, %v549_v15  ;;  %v552_v26 = vld [vmem:[%s2031_s1 + $0x470] sm:$0xff]  ;;  %v559_v28 = vld [vmem:[%s2031_s1 + $0x4a8] sm:$0xff]  ;;  %v557_v29 = vld [vmem:[%s2031_s1 + $0x498] sm:$0xff] }
  0xf1   : > { %1223 = vmatpush1.bf16.msra.mxu0 %v1222_v21  ;;  %v1244_v21 = vpack.c.bf16 %v551_v14, %v547_v13  ;;  %v561_v30 = vld [vmem:[%s2031_s1 + $0x4b8] sm:$0xff]  ;;  %v1342_v32 = vpack.c.bf16 %v552_v26, %v548_v24  ;;  %v556_v36 = vld [vmem:[%s2031_s1 + $0x490] sm:$0xff]  ;;  %v567_v40 = vld [vmem:[%s2031_s1 + $0x4e8] sm:$0xff] }
  0xf2   : > { %1319 = vmatpush1.bf16.msra.mxu1 %v1318_v22  ;;  %1225 = vmatprep.subr.bf16.mxu0 %v1224_v23  ;;  %v546_v22 = vld [vmem:[%s2031_s1 + $0x440] sm:$0xff]  ;;  %v1344_v37 = vpack.c.bf16 %v561_v30, %v557_v29  ;;  %v560_v38 = vld [vmem:[%s2031_s1 + $0x4b0] sm:$0xff]  ;;  %v565_v42 = vld [vmem:[%s2031_s1 + $0x4d8] sm:$0xff] }
  0xf3   : > { %1321 = vmatprep.subr.bf16.mxu1 %v1320_v27  ;;  %v550_v23 = vld [vmem:[%s2031_s1 + $0x460] sm:$0xff]  ;;  %v555_v27 = vld [vmem:[%s2031_s1 + $0x488] sm:$0xff]  ;;  %v569_v43 = vld [vmem:[%s2031_s1 + $0x4f8] sm:$0xff] }
  0xf4   : > { %v1246_v31 = vpack.c.bf16 %v550_v23, %v546_v22  ;;  %v566_v48 = vld [vmem:[%s2031_s1 + $0x4e0] sm:$0xff]  ;;  %v564_v49 = vld [vmem:[%s2031_s1 + $0x4d0] sm:$0xff]  ;;  %v1348_v50 = vpack.c.bf16 %v569_v43, %v565_v42  ;;  %v571_v52 = vld [vmem:[%s2031_s1 + $0x508] sm:$0xff] }
  0xf5   : > { %1227 = vmatpush1.bf16.msra.mxu0 %v1226_v33  ;;  %v1248_v33 = vpack.c.bf16 %v559_v28, %v555_v27  ;;  %v575_v53 = vld [vmem:[%s2031_s1 + $0x528] sm:$0xff]  ;;  %v573_v54 = vld [vmem:[%s2031_s1 + $0x518] sm:$0xff]  ;;  %v574_v60 = vld [vmem:[%s2031_s1 + $0x520] sm:$0xff] }
  0xf6   : > { %1323 = vmatpush1.bf16.msra.mxu1 %v1322_v34  ;;  %1229 = vmatprep.subr.bf16.mxu0 %v1228_v35  ;;  %v554_v34 = vld [vmem:[%s2031_s1 + $0x480] sm:$0xff]  ;;  %v577_v55 = vld [vmem:[%s2031_s1 + $0x538] sm:$0xff]  ;;  %v572_v61 = vld [vmem:[%s2031_s1 + $0x510] sm:$0xff] }
  0xf7   : > { %1325 = vmatprep.subr.bf16.mxu1 %v1324_v39  ;;  %v558_v35 = vld [vmem:[%s2031_s1 + $0x4a0] sm:$0xff]  ;;  %v563_v39 = vld [vmem:[%s2031_s1 + $0x4c8] sm:$0xff]  ;;  %v1352_v62 = vpack.c.bf16 %v577_v55, %v573_v54  ;;  %v581_v2 = vld [vmem:[%s2031_s1 + $0x558] sm:$0xff] }
  0xf8   : > { %v1250_v44 = vpack.c.bf16 %v558_v35, %v554_v34  ;;  %v579_v0 = vld [vmem:[%s2031_s1 + $0x548] sm:$0xff]  ;;  %v585_v3 = vld [vmem:[%s2031_s1 + $0x578] sm:$0xff]  ;;  %v582_v8 = vld [vmem:[%s2031_s1 + $0x560] sm:$0xff] }
  0xf9   : > { %1231 = vmatpush1.bf16.msra.mxu0 %v1230_v45  ;;  %v1346_v45 = vpack.c.bf16 %v560_v38, %v556_v36  ;;  %v583_v1 = vld [vmem:[%s2031_s1 + $0x568] sm:$0xff]  ;;  %v580_v9 = vld [vmem:[%s2031_s1 + $0x550] sm:$0xff]  ;;  %v1356_v10 = vpack.c.bf16 %v585_v3, %v581_v2  ;;  %v589_v14 = vld [vmem:[%s2031_s1 + $0x598] sm:$0xff] }
  0xfa   : > { %1327 = vmatpush1.bf16.msra.mxu1 %v1326_v46  ;;  %1233 = vmatprep.subr.bf16.mxu0 %v1232_v47  ;;  %v1252_v46 = vpack.c.bf16 %v567_v40, %v563_v39  ;;  %v562_v47 = vld [vmem:[%s2031_s1 + $0x4c0] sm:$0xff]  ;;  %v587_v12 = vld [vmem:[%s2031_s1 + $0x588] sm:$0xff]  ;;  %v593_v15 = vld [vmem:[%s2031_s1 + $0x5b8] sm:$0xff]  ;;  %v607_v39 = vlaneseq }
  0xfb   : > { %1329 = vmatprep.subr.bf16.mxu1 %v1328_v51  ;;  %v568_v51 = vld [vmem:[%s2031_s1 + $0x4f0] sm:$0xff]  ;;  %v1254_v56 = vpack.c.bf16 %v566_v48, %v562_v47  ;;  %v591_v13 = vld [vmem:[%s2031_s1 + $0x5a8] sm:$0xff]  ;;  %v1360_v23 = vpack.c.bf16 %v593_v15, %v589_v14  ;;  %v597_v27 = vld [vmem:[%s2031_s1 + $0x5d8] sm:$0xff] }
  0xfc   : > { %v588_v22 = vld [vmem:[%s2031_s1 + $0x590] sm:$0xff]  ;;  %v599_v26 = vld [vmem:[%s2031_s1 + $0x5e8] sm:$0xff]  ;;  %v601_v28 = vld [vmem:[%s2031_s1 + $0x5f8] sm:$0xff]  ;;  %v608_v40 = vshrl.u32 %v607_v39, 7 }
  0xfd   : > { %1235 = vmatpush1.bf16.msra.mxu0 %v1234_v57  ;;  %v1350_v57 = vpack.c.bf16 %v568_v51, %v564_v49  ;;  %v592_v24 = vld [vmem:[%s2031_s1 + $0x5b0] sm:$0xff]  ;;  %v1364_v34 = vpack.c.bf16 %v601_v28, %v597_v27  ;;  %v605_v42 = vld [vmem:[%s2038_s3] sm:$0xf] }
  0xfe   : > { %1331 = vmatpush1.bf16.msra.mxu1 %v1330_v58  ;;  %1237 = vmatprep.subr.bf16.mxu0 %v1236_v59  ;;  %v1256_v58 = vpack.c.bf16 %v575_v53, %v571_v52  ;;  %v570_v59 = vld [vmem:[%s2031_s1 + $0x500] sm:$0xff]  ;;  %v1362_v30 = vpack.c.bf16 %v592_v24, %v588_v22  ;;  %v596_v35 = vld [vmem:[%s2031_s1 + $0x5d0] sm:$0xff]  ;;  %v613_v43 = vsub.s32 1, %v608_v40  ;;  %v621_v52 = vsub.s32 3, %v608_v40 }
  0xff   : > { %1333 = vmatprep.subr.bf16.mxu1 %v1332_v63  ;;  %v576_v63 = vld [vmem:[%s2031_s1 + $0x530] sm:$0xff]  ;;  %v1258_v4 = vpack.c.bf16 %v574_v60, %v570_v59 }
 0x100   : > { %v600_v36 = vld [vmem:[%s2031_s1 + $0x5f0] sm:$0xff] }
 0x101   : > { %1239 = vmatpush1.bf16.msra.mxu0 %v1238_v5  ;;  %v1354_v5 = vpack.c.bf16 %v576_v63, %v572_v61  ;;  %v1366_v38 = vpack.c.bf16 %v600_v36, %v596_v35 }
 0x102   : > { %1335 = vmatpush1.bf16.msra.mxu1 %v1334_v6  ;;  %1241 = vmatprep.subr.bf16.mxu0 %v1240_v7  ;;  %v1260_v6 = vpack.c.bf16 %v583_v1, %v579_v0  ;;  %v578_v7 = vld [vmem:[%s2031_s1 + $0x540] sm:$0xff]  ;;  %v924_v1 = vld [vmem:[%s333_s19] sm:$0xff] }
 0x103   : > { %1337 = vmatprep.subr.bf16.mxu1 %v1336_v11  ;;  %v584_v11 = vld [vmem:[%s2031_s1 + $0x570] sm:$0xff]  ;;  %v1262_v16 = vpack.c.bf16 %v582_v8, %v578_v7 }
 0x104   : > { %692 = vmatmul.mubr.f32.vlgmr.msra.gmra.mrb[0].mxu0 %v602_v17 }
 0x105   : > { %1243 = vmatpush1.bf16.msra.mxu0 %v1242_v18  ;;  %834 = vmatmul.mubr.f32.vlgmr.msra.gmra.mrb[0].mxu1 %v602_v17  ;;  %v1358_v17 = vpack.c.bf16 %v584_v11, %v580_v9  ;;  %v1264_v18 = vpack.c.bf16 %v591_v13, %v587_v12  ;;  %v1734_v12 = vmov (!%p1168_p4), 0.0  }
 0x106   : > { %1339 = vmatpush1.bf16.msra.mxu1 %v1338_v20  ;;  %1245 = vmatprep.subr.bf16.mxu0 %v1244_v21  ;;  %v586_v20 = vld [vmem:[%s2031_s1 + $0x580] sm:$0xff]  ;;  %938 = vst [vmem:[#allocation2 + $0x8] sm:$0xff] (!%p1168_p4), %v1734_v12 }
 0x107   : > { %1341 = vmatprep.subr.bf16.mxu1 %v1340_v25  ;;  %762 = vmatprep.mubr.f32.mxu0 %v1733_v41  ;;  %v590_v21 = vld [vmem:[%s2031_s1 + $0x5a0] sm:$0xff]  ;;  %v595_v25 = vld [vmem:[%s2031_s1 + $0x5c8] sm:$0xff] }
 0x108   : > { %904 = vmatprep.mubr.f32.mxu1 %v1733_v41  ;;  %v1266_v29 = vpack.c.bf16 %v590_v21, %v586_v20  ;;  %v609_v41 = vsub.s32 0, %v608_v40 }
 0x109   : > { %1247 = vmatpush1.bf16.msra.mxu0 %v1246_v31  ;;  %v1268_v31 = vpack.c.bf16 %v599_v26, %v595_v25 }
 0x10a   : > { %1343 = vmatpush1.bf16.msra.mxu1 %v1342_v32  ;;  %1249 = vmatprep.subr.bf16.mxu0 %v1248_v33  ;;  %v594_v32 = vld [vmem:[%s2031_s1 + $0x5c0] sm:$0xff] }
 0x10b   : > { %1345 = vmatprep.subr.bf16.mxu1 %v1344_v37  ;;  %v598_v33 = vld [vmem:[%s2031_s1 + $0x5e0] sm:$0xff] }
 0x10c   : > { %v1270_v37 = vpack.c.bf16 %v598_v33, %v594_v32 }
 0x10d   : > { %1251 = vmatpush1.bf16.msra.mxu0 %v1250_v44  ;;  %v610_v44 = vrot.slane %v605_v42, %v609_v41 }
 0x10e   : > { %1347 = vmatpush1.bf16.msra.mxu1 %v1346_v45  ;;  %1253 = vmatprep.subr.bf16.mxu0 %v1252_v46  ;;  %v617_v45 = vsub.s32 2, %v608_v40  ;;  %v614_v46 = vrot.slane %v605_v42, %v613_v43 }
 0x10f   : > { %1349 = vmatprep.subr.bf16.mxu1 %v1348_v50 }
 0x110   : > { %v618_v49 = vrot.slane %v605_v42, %v617_v45 }
 0x111   : > { %1255 = vmatpush1.bf16.msra.mxu0 %v1254_v56 }
 0x112   : > { %1351 = vmatpush1.bf16.msra.mxu1 %v1350_v57  ;;  %1257 = vmatprep.subr.bf16.mxu0 %v1256_v58  ;;  %v622_v57 = vrot.slane %v605_v42, %v621_v52 }
 0x113   : > { %1353 = vmatprep.subr.bf16.mxu1 %v1352_v62 }
 0x115   : > { %1259 = vmatpush1.bf16.msra.mxu0 %v1258_v4 }
 0x116   : > { %1355 = vmatpush1.bf16.msra.mxu1 %v1354_v5  ;;  %1261 = vmatprep.subr.bf16.mxu0 %v1260_v6 }
 0x117   : > { %1357 = vmatprep.subr.bf16.mxu1 %v1356_v10 }
 0x119   : > { %1263 = vmatpush1.bf16.msra.mxu0 %v1262_v16 }
 0x11a   : > { %1359 = vmatpush1.bf16.msra.mxu1 %v1358_v17  ;;  %1265 = vmatprep.subr.bf16.mxu0 %v1264_v18 }
 0x11b   : > { %1361 = vmatprep.subr.bf16.mxu1 %v1360_v23 }
 0x11d   : > { %1267 = vmatpush1.bf16.msra.mxu0 %v1266_v29 }
 0x11e   : > { %1363 = vmatpush1.bf16.msra.mxu1 %v1362_v30  ;;  %1269 = vmatprep.subr.bf16.mxu0 %v1268_v31 }
 0x11f   : > { %1365 = vmatprep.subr.bf16.mxu1 %v1364_v34 }
 0x121   : > { %1271 = vmatpush1.bf16.msra.mxu0 %v1270_v37 }
 0x122   : > { %1367 = vmatpush1.bf16.msra.mxu1 %v1366_v38 }
 0x124   : > { %763 = vmatmul.mubr.f32.vlgmr.msra.gmra.mrb[0].mxu0 %v2186_v19 }
 0x125   : > { %905 = vmatmul.mubr.f32.vlgmr.msra.gmra.mrb[0].mxu1 %v2186_v19 }
 0x1f7   : > { %v764_v47 = vpop.f32.mrb[0].mxu0 }
 0x1f8   : > { %v1368_v48 = vadd.f32 %v764_v47, %v610_v44  ;;  %v906_v50 = vpop.f32.mrb[0].mxu1  ;;  %v766_v51 = vpop.f32.mrb[1].mxu0 }
 0x1f9   : > { %v1369_v53 = vadd.f32 %v766_v51, %v614_v46  ;;  %v908_v54 = vpop.f32.mrb[1].mxu1  ;;  %v1370_v56 = vadd.f32 %v906_v50, %v618_v49 }
 0x1fa   : > { %v911_v55 = vmul.f32 0.5, %v1368_v48  ;;  %v1371_v58 = vadd.f32 %v908_v54, %v622_v57 }
 0x1fb   : > { %v915_v19 = vmul.f32 0.5, %v1369_v53 }
 0x1fc   : > { %1460 = vtanh.f32 %v911_v55  ;;  %v920_v59 = vmul.f32 0.5, %v1371_v58 }
 0x1fd   : > { %1462 = vtanh.f32 %v915_v19 }
 0x1fe   : > { %1464 = vtanh.f32 %v1370_v56 }
 0x1ff   : > { %1466 = vtanh.f32 %v920_v59 }
 0x206   : > { %v1461_v60 = vpop.eup %1460 }
 0x207   : > { %v1463_v61 = vpop.eup %1462  ;;  %v913_v62 = vadd.f32 1.0, %v1461_v60 }
 0x208   : > { %v917_v63 = vadd.f32 1.0, %v1463_v61  ;;  %v1465_v2 = vpop.eup %1464 }
 0x209   : > { %v914_v0 = vmul.f32 0.5, %v913_v62  ;;  %v1467_v7 = vpop.eup %1466 }
 0x20a   : > { %v918_v3 = vmul.f32 0.5, %v917_v63  ;;  %v922_v8 = vadd.f32 1.0, %v1467_v7 }
 0x20b   : > { %v926_v4 = vmul.f32 %v1465_v2, %v914_v0 }
 0x20c   : > { %v925_v5 = vmul.f32 %v924_v1, %v918_v3  ;;  %v923_v9 = vmul.f32 0.5, %v922_v8 }
 0x20e   : > { %v927_v6 = vadd.f32 %v926_v4, %v925_v5 }
 0x210   : > { %1468 = vtanh.f32 %v927_v6  ;;  %930 = vst [vmem:[%s399_s26] sm:$0xff] %v927_v6 }
 0x217   : > { %936 = sbr.rel (%p1168_p4) target bundleno = 542 (0x21e), region = 68 }
 0x21a   : > { %v1469_v10 = vpop.eup %1468 }
 0x21b   : > { %v929_v11 = vmul.f32 %v1469_v10, %v923_v9 }
 0x21d   : > { %931 = vst [vmem:[%s392_s18] sm:$0xff] %v929_v11  ;;  %937 = vst [vmem:[#allocation2] sm:$0xff] (!%p1168_p4), %v929_v11 }
 0x21e PF: > { %s1171_s30 = sshll.u32 %s1901_s27, 7  ;;  %s958_s13 = sshll.u32 %s392_s18, 4  ;;  %s959_s13 = int_to_ptr.vmem [resolvable:$true] %s958_s13 }
 0x21f   : > { %s2258_s28 = scalar_lea.hbm %s2330_s5, %s1171_s30  ;;  %s940_s20 = scalar_lea.sflag [#allocation5], %s2019_s9 }
 0x220   : > { %s1618_s16 = scalar_lea.vmem %s959_s13, 128  ;;  %p2368_p3 = scmp.ne.s32.totalorder %s2353_s10, 0 }
 0x221   : > { %p1619_p5 = scmp.ne.s32.totalorder %s959_s13, %s1618_s16  ;;  %s1735_s7 = smov [#allocation12]  }
 0x222   : > { %s1622_s29 = sshll.u32 %s1735_s7, 4  ;;  %s1623_s29 = int_to_ptr.vmem [resolvable:$false] %s1622_s29 }
 0x223   : > { %p1620_p2 = pnand %p1619_p5, %p2368_p3  ;;  %s1624_s19 = scalar_lea.vmem %s1623_s29, 256 }
 0x224   : > { %p1625_p6 = scmp.lt.s32.totalorder %s959_s13, %s1623_s29  ;;  %p1626_p11 = scmp.lt.s32.totalorder %s1624_s19, %s1618_s16 }
 0x225   : > { %p1621_p0 = pneg %p1620_p2 }
 0x226   : > { %p1627_p1 = por %p1626_p11, %p1625_p6 }
 0x228   : > { %p1628_p9 = pnand %p1627_p1, %p1621_p0 }
 0x22a   : > { %1631 = shalt.err (!%p1628_p9)
}
 0x22b   : > { %s1632_s11 = scalar_lea.hbm %s2258_s28, 128  ;;  %s1636_s3 = scalar_lea.hbm %s2330_s5, 256 }
 0x22c   : > { %p1633_p8 = scmp.ne.s32.totalorder %s2258_s28, %s1632_s11  ;;  %p1637_p7 = scmp.lt.u32.totalorder %s2258_s28, %s2330_s5 }
 0x22d   : > { %p1638_p13 = scmp.lt.u32.totalorder %s1636_s3, %s1632_s11  ;;  %p1640_p5 = scmp.lt.u32.totalorder %s1632_s11, %s2258_s28 }
 0x22e   : > { %p1634_p12 = pnand %p1633_p8, %p2368_p3 }
 0x22f   : > { %p1639_p4 = por %p1638_p13, %p1637_p7 }
 0x230   : > { %p1635_p10 = pneg %p1634_p12 }
 0x231   : > { %p1641_p2 = por %p1640_p5, %p1639_p4 }
 0x233   : > { %p1642_p0 = pnand %p1641_p2, %p1635_p10 }
 0x235   : > { %1645 = shalt.err (!%p1642_p0)
}
 0x236   : > { %1391 = dma.vmem_to_hbm [thread:$0]  (%p2368_p3), %s959_s13, 128, %s2258_s28, %s940_s20  }
 0x237   : > { %s2285_s16 = scalar_lea.hbm %s2331_s6, %s1171_s30  ;;  %s971_s7 = sshll.u32 %s399_s26, 4  ;;  %s972_s7 = int_to_ptr.vmem [resolvable:$true] %s971_s7 }
 0x238   : > { %s945_s29 = scalar_lea.sflag [#allocation14], %s2019_s9  ;;  %s1646_s19 = scalar_lea.vmem %s972_s7, 128 }
 0x239   : > { %p1647_p6 = scmp.ne.s32.totalorder %s972_s7, %s1646_s19  ;;  %s1736_s11 = smov [#allocation13]  }
 0x23a   : > { %s1650_s1 = sshll.u32 %s1736_s11, 4  ;;  %s1651_s1 = int_to_ptr.vmem [resolvable:$false] %s1650_s1 }
 0x23b   : > { %p1648_p11 = pnand %p1647_p6, %p2368_p3  ;;  %s1652_s17 = scalar_lea.vmem %s1651_s1, 256 }
 0x23c   : > { %p1653_p9 = scmp.lt.s32.totalorder %s972_s7, %s1651_s1  ;;  %p1654_p8 = scmp.lt.s32.totalorder %s1652_s17, %s1646_s19 }
 0x23d   : > { %p1649_p1 = pneg %p1648_p11 }
 0x23e   : > { %p1655_p12 = por %p1654_p8, %p1653_p9 }
 0x240   : > { %p1656_p10 = pnand %p1655_p12, %p1649_p1 }
 0x242   : > { %1659 = shalt.err (!%p1656_p10)
}
 0x243   : > { %s1660_s27 = scalar_lea.hbm %s2285_s16, 128  ;;  %s1664_s26 = scalar_lea.hbm %s2331_s6, 256 }
 0x244   : > { %p1661_p7 = scmp.ne.s32.totalorder %s2285_s16, %s1660_s27  ;;  %p1665_p5 = scmp.lt.u32.totalorder %s2285_s16, %s2331_s6 }
 0x245   : > { %p1666_p2 = scmp.lt.u32.totalorder %s1664_s26, %s1660_s27  ;;  %p1668_p6 = scmp.lt.u32.totalorder %s1660_s27, %s2285_s16 }
 0x246   : > { %p1662_p13 = pnand %p1661_p7, %p2368_p3 }
 0x247   : > { %p1667_p0 = por %p1666_p2, %p1665_p5 }
 0x248   : > { %p1663_p4 = pneg %p1662_p13 }
 0x249   : > { %p1669_p11 = por %p1668_p6, %p1667_p0 }
 0x24b   : > { %p1670_p1 = pnand %p1669_p11, %p1663_p4 }
 0x24d   : > { %1673 = shalt.err (!%p1670_p1)
}
 0x24e   : > { %1392 = dma.vmem_to_hbm [thread:$0]  (%p2368_p3), %s972_s7, 128, %s2285_s16, %s945_s29  }
 0x24f PF: > { %s983_s13 = sand.u32 1, %s1712_s21   ;;  %p2369_p9 = scmp.ne.s32.totalorder %s2354_s15, 0 }
 0x250   : > { %p2370_p8 = scmp.ge.s32.totalorder %s1724_s24, 2  ;;  %s984_s20 = scalar_lea.sflag [#allocation5], %s983_s13 }
 0x252   : > { %p1413_p12 = pnand %p2370_p8, %p2369_p9 }
 0x254   : > { %1703 = dma.done.wait (!%p1413_p12), %s984_s20, 128  }
 0x255   : > { %1705 = vsyncadd (!%p1413_p12), %s984_s20, 4294967168  ;;  %s993_s3 = scalar_lea.sflag [#allocation14], %s983_s13 }
 0x256   : > { %1707 = dma.done.wait (!%p1413_p12), %s993_s3, 128  }
 0x257   : > { %1709 = vsyncadd (!%p1413_p12), %s993_s3, 4294967168  ;;  %s2371_s18 = sld [smem:[#allocation20_spill]]  ;;  %s2372_s23 = sld [smem:[#allocation21_spill]] }
 0x258   : > { %p27_p3 = scmp.ge.s32.totalorder %s1793_s25, 4   ;;  %s2373_s21 = smov %s1716_s22 }
 0x259   : > { %s2375_s24 = smov %s1793_s25 }
 0x25a   :  { %29 = sbr.rel (!%p27_p3) target bundleno = 13 (0xd), region = 150 }
 0x25d   : > { %s2374_s22 = smov %s2371_s18 }
 0x261   :  { %998 = vsyncpa [#allocation4], 1 }
 0x262   :  { %1000 = vsyncpa [#allocation4 + $0x1], 1 }
 0x263   :  { %1001 = vsyncpa [#allocation7], 1 }
 0x264   :  { %1003 = vsyncpa [#allocation7 + $0x1], 1 }
 0x265   :  { %1004 = vsyncpa [#allocation10], 1 }
 0x266   :  { %1006 = vsyncpa [#allocation10 + $0x1], 1 }
 0x267   :  { %1007 = vsyncpa [#allocation5], 1 }
 0x268   :  { %1009 = vsyncpa [#allocation5 + $0x1], 1 }
 0x269   :  { %1010 = vsyncpa [#allocation14], 1 }
 0x26a   :  { %1012 = vsyncpa [#allocation14 + $0x1], 1 }

</bundles_post_ra>
